<compile_context>
chip_gen: v7x
topology: tpu7x:2x2x1
jax: 0.10.0
libtpu: 0.0.40
codegen_flags: <defaults>
</compile_context>

<pallas_src>
import functools
import math

import jax
import jax.numpy as jnp
from jax.experimental import pallas as pl
from jax.experimental.pallas import tpu as pltpu


def _round_up(x: int, m: int) -> int:
    return ((x + m - 1) // m) * m


def _cdiv(a: int, b: int) -> int:
    return -(-a // b)


def _token_tiles(n: int, tm: int, *, min_steps: int = 2):
    """Pick (tile, padded_n, steps) for the token axis.

    - Bounded padding waste: tile ~= round_up(cdiv(n, steps), 8) instead of
      round_up(n, tm) (e.g. n=300, tm=512 -> 304 padded rows, not 512).
    - >=2 grid steps whenever possible so v7x's two TensorCores are both used and the
      double-buffered DMA pipeline actually overlaps.
    """
    steps = max(_cdiv(n, tm), 1)
    if steps < min_steps and n > 8:
        steps = min(min_steps, _cdiv(n, 8))
    tile = _round_up(_cdiv(n, steps), 8)
    steps = _cdiv(n, tile)
    return tile, steps * tile, steps


def _d_tile(d: int, max_td: int = 1024) -> int:
    """Largest lane-aligned divisor of d that is <= max_td (falls back to full d)."""
    if d <= max_td or d % 128 != 0:
        return d
    best = 128
    td = 128
    while td <= max_td:
        if d % td == 0:
            best = td
        td += 128
    return best


# --------------------------------------------------------------------------------------
# Kernel 1: fully fused SoftMoE  (E expert MLPs + softmax gating + weighted combine)
# --------------------------------------------------------------------------------------
def _softmoe_fused_kernel(x_ref, g_ref, w1_ref, b1_ref, w2_ref, b2_ref, o_ref, *,
                          num_experts: int, hidden_dim: int):
    # x:(tm,Din) g:(tm,E) w1:(Din,E*H) b1:(1,E*H) w2:(E*H,Dout) b2:(E,Dout) o:(tm,Dout)
    g = g_ref[...].astype(jnp.float32)
    g = g - jnp.max(g, axis=-1, keepdims=True)            # numerically stable softmax
    p = jnp.exp(g)                                        # EUP
    w = p / jnp.sum(p, axis=-1, keepdims=True)            # (tm, E) gate weights, f32

    # One wide first matmul over ALL experts: N = E*H fills the 256-wide MXU.
    # (for very large weights, cast x/w1 to bf16 here and keep f32 accumulation)
    h = jnp.dot(x_ref[...], w1_ref[...], preferred_element_type=jnp.float32)
    h = h + b1_ref[...].astype(jnp.float32)
    h = h * jax.nn.sigmoid(h)                              # SiLU, f32, stays in VMEM

    # Gate-scale each expert's hidden slice, then ONE K = E*H second matmul:
    #   sum_e w_e * (h_e @ W2_e)  ==  concat_e(w_e * h_e) @ stack_e(W2_e)
    hw = jnp.concatenate(
        [w[:, e:e + 1] * h[:, e * hidden_dim:(e + 1) * hidden_dim]
         for e in range(num_experts)], axis=-1)
    y = jnp.dot(hw.astype(w2_ref.dtype), w2_ref[...],
                preferred_element_type=jnp.float32)
    # Gate-weighted biases on the VPU:  sum_e w_e * b2_e
    for e in range(num_experts):
        y = y + w[:, e:e + 1] * b2_ref[e:e + 1, :].astype(jnp.float32)
    o_ref[...] = y.astype(o_ref.dtype)


def prep_expert_params(expert_params):
    """Stack per-expert (W1 (Din,H), b1, W2 (H,Dout), b2) ONCE into fused-kernel layout."""
    w1 = jnp.concatenate([p[0] for p in expert_params], axis=1)                        # (Din, E*H)
    b1 = jnp.concatenate([jnp.reshape(p[1], (1, -1)) for p in expert_params], axis=1)  # (1, E*H)
    w2 = jnp.concatenate([p[2] for p in expert_params], axis=0)                        # (E*H, Dout)
    b2 = jnp.stack([jnp.reshape(p[3], (-1,)) for p in expert_params], axis=0)          # (E, Dout)
    return w1, b1, w2, b2


def soft_moe_fused_forward(x, gate_logits, stacked_params, *, num_experts, hidden_dim,
                           training=False, noisy_gating=True, gate_noise_std=1.0,
                           aux_loss_coef=0.01, noise_key=None, tm=512):
    """Fused SoftMoE: expert MLPs + gating combine in ONE pallas_call.

    stacked_params = prep_expert_params(expert_params)  (prep once, reuse every call).
    Returns (moe_output, None) in eval mode, (moe_output, aux_loss) in training mode.
    """
    w1s, b1s, w2s, b2s = stacked_params
    d_in = x.shape[-1]
    d_out = w2s.shape[-1]
    lead = x.shape[:-1]
    n = int(math.prod(lead)) if lead else 1

    if training and noisy_gating and noise_key is not None:
        gate_logits = gate_logits + gate_noise_std * jax.random.normal(
            noise_key, gate_logits.shape, gate_logits.dtype)

    x2 = x.reshape(n, d_in)
    g2 = gate_logits.reshape(n, num_experts)

    tm_eff, n_pad, n_steps = _token_tiles(n, tm)
    if n_pad != n:
        x2 = jnp.pad(x2, ((0, n_pad - n), (0, 0)))
        g2 = jnp.pad(g2, ((0, n_pad - n), (0, 0)))

    eh = num_experts * hidden_dim
    kernel = functools.partial(_softmoe_fused_kernel,
                               num_experts=num_experts, hidden_dim=hidden_dim)
    # NOTE: weight BlockSpecs have a constant index_map so they stay VMEM-resident across
    # the token grid.  For very large weights on v7x (64 MiB VMEM) add
    # pipeline_mode=pl.Buffered(1) to the weight specs and/or a K-reduction grid axis.
    out = pl.pallas_call(
        kernel,
        out_shape=jax.ShapeDtypeStruct((n_pad, d_out), x.dtype),
        grid_spec=pltpu.PrefetchScalarGridSpec(
            num_scalar_prefetch=0,
            grid=(n_steps,),
            in_specs=[
                pl.BlockSpec((tm_eff, d_in), lambda i: (i, 0)),          # x tile
                pl.BlockSpec((tm_eff, num_experts), lambda i: (i, 0)),   # gate logits
                pl.BlockSpec((d_in, eh), lambda i: (0, 0)),              # W1 (resident)
                pl.BlockSpec((1, eh), lambda i: (0, 0)),                 # b1
                pl.BlockSpec((eh, d_out), lambda i: (0, 0)),             # W2 (resident)
                pl.BlockSpec((num_experts, d_out), lambda i: (0, 0)),    # b2
            ],
            out_specs=pl.BlockSpec((tm_eff, d_out), lambda i: (i, 0)),
        ),
        compiler_params=pltpu.CompilerParams(dimension_semantics=("parallel",)),
    )(x2, g2, w1s, b1s, w2s, b2s)

    moe_output = out[:n].reshape(*lead, d_out)
    if not training:
        return moe_output, None
    gw = jax.nn.softmax(gate_logits.astype(jnp.float32), axis=-1)
    load = gw.reshape(n, num_experts).mean(axis=0)
    return moe_output, jnp.sum(load * load) * aux_loss_coef


# --------------------------------------------------------------------------------------
# Kernel 2: external-experts combine  (softmax gating + weighted sum of expert outputs)
# --------------------------------------------------------------------------------------
def _softmoe_combine_kernel(g_ref, eo_ref, o_ref, *, num_experts: int):
    # g: (tm, E)   eo: (E, tm, td)   o: (tm, td)
    g = g_ref[...].astype(jnp.float32)
    g = g - jnp.max(g, axis=-1, keepdims=True)
    p = jnp.exp(g)
    w = p / jnp.sum(p, axis=-1, keepdims=True)             # (tm, E) gate weights

    acc = w[:, 0:1] * eo_ref[0].astype(jnp.float32)
    for e in range(1, num_experts):
        acc = acc + w[:, e:e + 1] * eo_ref[e].astype(jnp.float32)
    o_ref[...] = acc.astype(o_ref.dtype)


def soft_moe_forward(x, expert_outputs, gate_logits, *, training=False,
                     noisy_gating=True, gate_noise_std=1.0, aux_loss_coef=0.01,
                     noise_key=None, tm=512):
    """Module default config: external experts + external gate (combine only).

    expert_outputs: list/tuple of E arrays [..., D]  (stacked expert-major internally;
    a pre-stacked (E, ..., D) array is also accepted).  [..., E, D] slabs are NOT
    accepted — converting them would need a full HBM transpose (perf-review item).
    """
    del x  # only needed by the internal-gate / internal-experts paths
    if isinstance(expert_outputs, (list, tuple)):
        eo = jnp.stack(expert_outputs, axis=0)              # (E, ..., D), no transpose
    else:
        eo = expert_outputs                                 # must already be (E, ..., D)

    if training and noisy_gating and noise_key is not None:
        gate_logits = gate_logits + gate_noise_std * jax.random.normal(
            noise_key, gate_logits.shape, gate_logits.dtype)

    lead = gate_logits.shape[:-1]
    num_experts = gate_logits.shape[-1]
    d_out = eo.shape[-1]
    n = int(math.prod(lead)) if lead else 1

    g2 = gate_logits.reshape(n, num_experts)
    eo3 = eo.reshape(num_experts, n, d_out)

    tm_eff, n_pad, n_steps = _token_tiles(n, tm)
    if n_pad != n:
        g2 = jnp.pad(g2, ((0, n_pad - n), (0, 0)))
        eo3 = jnp.pad(eo3, ((0, 0), (0, n_pad - n), (0, 0)))

    td = _d_tile(d_out)          # cap the (E, tm, td) eo block when E*D is large
    d_steps = d_out // td

    kernel = functools.partial(_softmoe_combine_kernel, num_experts=num_experts)
    out = pl.pallas_call(
        kernel,
        out_shape=jax.ShapeDtypeStruct((n_pad, d_out), eo.dtype),
        grid_spec=pltpu.PrefetchScalarGridSpec(
            num_scalar_prefetch=0,
            grid=(n_steps, d_steps),
            in_specs=[
                pl.BlockSpec((tm_eff, num_experts), lambda i, j: (i, 0)),
                pl.BlockSpec((num_experts, tm_eff, td), lambda i, j: (0, i, j)),
            ],
            out_specs=pl.BlockSpec((tm_eff, td), lambda i, j: (i, j)),
        ),
        compiler_params=pltpu.CompilerParams(
            dimension_semantics=("parallel", "parallel")),
    )(g2, eo3)

    moe_output = out[:n].reshape(*lead, d_out)
    if not training:
        return moe_output, None
    # Training-mode aux loss: tiny O(N*E) reduction on the (noisy) logits, plain jnp.
    gw = jax.nn.softmax(gate_logits.astype(jnp.float32), axis=-1)
    load = gw.reshape(n, num_experts).mean(axis=0)
    return moe_output, jnp.sum(load * load) * aux_loss_coef


# --------------------------------------------------------------------------------------
# Pure-JAX references for correctness checking
# --------------------------------------------------------------------------------------
def expert_mlp_reference(x, w1, b1, w2, b2):
    hp = jax.lax.Precision.HIGHEST
    h = jnp.dot(x, w1, precision=hp) + b1
    h = h * jax.nn.sigmoid(h)
    return jnp.dot(h, w2, precision=hp) + b2


def soft_moe_reference(expert_outputs, gate_logits):
    eo = jnp.stack(expert_outputs, axis=-2)                        # [..., E, D]
    w = jax.nn.softmax(gate_logits.astype(jnp.float32), axis=-1)   # [..., E]
    return jnp.sum(w[..., None] * eo.astype(jnp.float32), axis=-2).astype(eo.dtype)


if __name__ == "__main__":
    key = jax.random.PRNGKey(0)
    batch, seq = 2, 8
    input_dim, hidden_dim, output_dim, num_experts = 128, 128, 128, 4

    key, kx, kg = jax.random.split(key, 3)
    x = jax.random.normal(kx, (batch, seq, input_dim), dtype=jnp.float32)
    gate_logits = jax.random.normal(kg, (batch, seq, num_experts), dtype=jnp.float32)

    # Per-expert parameters (PyTorch Linear-style init), kernel-friendly (in, out) layout.
    expert_params = []
    for _ in range(num_experts):
        key, k1, k2, k3, k4 = jax.random.split(key, 5)
        bnd1 = 1.0 / math.sqrt(input_dim)
        bnd2 = 1.0 / math.sqrt(hidden_dim)
        w1 = jax.random.uniform(k1, (input_dim, hidden_dim), jnp.float32, -bnd1, bnd1)
        b1 = jax.random.uniform(k2, (1, hidden_dim), jnp.float32, -bnd1, bnd1)
        w2 = jax.random.uniform(k3, (hidden_dim, output_dim), jnp.float32, -bnd2, bnd2)
        b2 = jax.random.uniform(k4, (1, output_dim), jnp.float32, -bnd2, bnd2)
        expert_params.append((w1, b1, w2, b2))

    # ---- Path A: fully fused experts + gating combine (one pallas_call) -------------
    stacked = prep_expert_params(expert_params)     # weight prep done ONCE
    moe_fused, aux = soft_moe_fused_forward(
        x, gate_logits, stacked, num_experts=num_experts, hidden_dim=hidden_dim,
        training=False)
    moe_fused = jax.block_until_ready(moe_fused)
    assert moe_fused.shape == (batch, seq, output_dim)
    assert aux is None

    eo_ref = [expert_mlp_reference(x, *p) for p in expert_params]
    ref = soft_moe_reference(eo_ref, gate_logits)
    assert jnp.allclose(moe_fused, ref, atol=2e-4, rtol=2e-4), "fused SoftMoE mismatch"

    # ---- Path B: module default config (external experts / gate) -> combine kernel --
    moe_ext, aux_ext = soft_moe_forward(x, eo_ref, gate_logits, training=False)
    moe_ext = jax.block_until_ready(moe_ext)
    assert moe_ext.shape == (batch, seq, output_dim)
    assert aux_ext is None
    assert jnp.allclose(moe_ext, ref, atol=1e-5, rtol=1e-5), "SoftMoE combine mismatch"

    # TODO(synk): training-mode gate noise + aux-loss load stay as tiny O(N*E) jnp ops in
    # the wrapper, and the internal (external_gate=False) nn.Linear gate is not kernelized
    # (default config uses an external gate).
    print("KERNEL_OK")
</pallas_src>

<mosaic_0001>
module attributes {stable_mosaic.version = 11 : i64} {
  func.func @_softmoe_fused_kernel(%arg0: i32, %arg1: memref<8x128xf32, #tpu.memory_space<vmem>>, %arg2: memref<8x4xf32, #tpu.memory_space<vmem>>, %arg3: memref<128x512xf32, #tpu.memory_space<vmem>>, %arg4: memref<1x512xf32, #tpu.memory_space<vmem>>, %arg5: memref<512x128xf32, #tpu.memory_space<vmem>>, %arg6: memref<4x128xf32, #tpu.memory_space<vmem>>, %arg7: memref<8x128xf32, #tpu.memory_space<vmem>>) attributes {dimension_semantics = [#tpu.dimension_semantics<parallel>], iteration_bounds = array<i64: 2>, scalar_prefetch = 0 : i64, scratch_operands = 0 : i64, tpu.core_type = #tpu.core_type<tc>, window_params = [{transform_indices = @transform_0, window_bounds = array<i64: 8, 128>}, {transform_indices = @transform_1, window_bounds = array<i64: 8, 4>}, {pipeline_mode = #tpu.pipeline_mode<synchronous>, transform_indices = @transform_2, window_bounds = array<i64: 128, 512>}, {pipeline_mode = #tpu.pipeline_mode<synchronous>, transform_indices = @transform_3, window_bounds = array<i64: 1, 512>}, {pipeline_mode = #tpu.pipeline_mode<synchronous>, transform_indices = @transform_4, window_bounds = array<i64: 512, 128>}, {pipeline_mode = #tpu.pipeline_mode<synchronous>, transform_indices = @transform_5, window_bounds = array<i64: 4, 128>}, {transform_indices = @transform_6, window_bounds = array<i64: 8, 128>}]} {
    %c0 = arith.constant 0 : index
    %c0_0 = arith.constant 0 : index
    %0 = vector.load %arg2[%c0, %c0_0] : memref<8x4xf32, #tpu.memory_space<vmem>>, vector<8x4xf32>
    %cst = arith.constant dense<0xFF800000> : vector<8xf32>
    %1 = vector.multi_reduction <maximumf>, %0, %cst [1] : vector<8x4xf32> to vector<8xf32>
    %2 = vector.shape_cast %1 : vector<8xf32> to vector<8x1xf32>
    %3 = vector.broadcast %2 : vector<8x1xf32> to vector<8x4xf32>
    %4 = arith.subf %0, %3 : vector<8x4xf32>
    %5 = math.exp %4 : vector<8x4xf32>
    %cst_1 = arith.constant dense<0.000000e+00> : vector<8xf32>
    %6 = vector.multi_reduction <add>, %5, %cst_1 [1] : vector<8x4xf32> to vector<8xf32>
    %7 = vector.shape_cast %6 : vector<8xf32> to vector<8x1xf32>
    %8 = vector.broadcast %7 : vector<8x1xf32> to vector<8x4xf32>
    %9 = arith.divf %5, %8 : vector<8x4xf32>
    %c0_2 = arith.constant 0 : index
    %c0_3 = arith.constant 0 : index
    %10 = vector.load %arg1[%c0_2, %c0_3] : memref<8x128xf32, #tpu.memory_space<vmem>>, vector<8x128xf32>
    %c0_4 = arith.constant 0 : index
    %c0_5 = arith.constant 0 : index
    %11 = vector.load %arg3[%c0_4, %c0_5] : memref<128x512xf32, #tpu.memory_space<vmem>>, vector<128x512xf32>
    %cst_6 = arith.constant dense<0.000000e+00> : vector<8x512xf32>
    %12 = tpu.matmul %10, %11, %cst_6 {dimension_numbers = #tpu.dot_dimension_numbers<[1], [0], [0], [1], [0, 0, 1, 1], [], []>} : vector<8x128xf32>, vector<128x512xf32>, vector<8x512xf32> -> vector<8x512xf32>
    %c0_7 = arith.constant 0 : index
    %c0_8 = arith.constant 0 : index
    %13 = vector.load %arg4[%c0_7, %c0_8] : memref<1x512xf32, #tpu.memory_space<vmem>>, vector<1x512xf32>
    %14 = vector.broadcast %13 : vector<1x512xf32> to vector<8x512xf32>
    %15 = arith.addf %12, %14 : vector<8x512xf32>
    %16 = arith.negf %15 : vector<8x512xf32>
    %17 = math.exp %16 : vector<8x512xf32>
    %cst_9 = arith.constant 1.000000e+00 : f32
    %18 = vector.broadcast %cst_9 : f32 to vector<8x512xf32>
    %19 = arith.addf %18, %17 : vector<8x512xf32>
    %20 = arith.divf %18, %19 : vector<8x512xf32>
    %21 = arith.mulf %15, %20 : vector<8x512xf32>
    %22 = vector.extract_strided_slice %9 {offsets = [0, 0], sizes = [8, 1], strides = [1, 1]} : vector<8x4xf32> to vector<8x1xf32>
    %23 = vector.extract_strided_slice %21 {offsets = [0, 0], sizes = [8, 128], strides = [1, 1]} : vector<8x512xf32> to vector<8x128xf32>
    %24 = vector.broadcast %22 : vector<8x1xf32> to vector<8x128xf32>
    %25 = arith.mulf %24, %23 : vector<8x128xf32>
    %26 = vector.extract_strided_slice %9 {offsets = [0, 1], sizes = [8, 1], strides = [1, 1]} : vector<8x4xf32> to vector<8x1xf32>
    %27 = vector.extract_strided_slice %21 {offsets = [0, 128], sizes = [8, 128], strides = [1, 1]} : vector<8x512xf32> to vector<8x128xf32>
    %28 = vector.broadcast %26 : vector<8x1xf32> to vector<8x128xf32>
    %29 = arith.mulf %28, %27 : vector<8x128xf32>
    %30 = vector.extract_strided_slice %9 {offsets = [0, 2], sizes = [8, 1], strides = [1, 1]} : vector<8x4xf32> to vector<8x1xf32>
    %31 = vector.extract_strided_slice %21 {offsets = [0, 256], sizes = [8, 128], strides = [1, 1]} : vector<8x512xf32> to vector<8x128xf32>
    %32 = vector.broadcast %30 : vector<8x1xf32> to vector<8x128xf32>
    %33 = arith.mulf %32, %31 : vector<8x128xf32>
    %34 = vector.extract_strided_slice %9 {offsets = [0, 3], sizes = [8, 1], strides = [1, 1]} : vector<8x4xf32> to vector<8x1xf32>
    %35 = vector.extract_strided_slice %21 {offsets = [0, 384], sizes = [8, 128], strides = [1, 1]} : vector<8x512xf32> to vector<8x128xf32>
    %36 = vector.broadcast %34 : vector<8x1xf32> to vector<8x128xf32>
    %37 = arith.mulf %36, %35 : vector<8x128xf32>
    %38 = tpu.concatenate %25, %29, %33, %37 in 1 : vector<8x128xf32>, vector<8x128xf32>, vector<8x128xf32>, vector<8x128xf32> -> vector<8x512xf32>
    %c0_10 = arith.constant 0 : index
    %c0_11 = arith.constant 0 : index
    %39 = vector.load %arg5[%c0_10, %c0_11] : memref<512x128xf32, #tpu.memory_space<vmem>>, vector<512x128xf32>
    %cst_12 = arith.constant dense<0.000000e+00> : vector<8x128xf32>
    %40 = tpu.matmul %38, %39, %cst_12 {dimension_numbers = #tpu.dot_dimension_numbers<[1], [0], [0], [1], [0, 0, 1, 1], [], []>} : vector<8x512xf32>, vector<512x128xf32>, vector<8x128xf32> -> vector<8x128xf32>
    %41 = vector.extract_strided_slice %9 {offsets = [0, 0], sizes = [8, 1], strides = [1, 1]} : vector<8x4xf32> to vector<8x1xf32>
    %c0_13 = arith.constant 0 : index
    %c0_14 = arith.constant 0 : index
    %42 = vector.load %arg6[%c0_13, %c0_14] : memref<4x128xf32, #tpu.memory_space<vmem>>, vector<1x128xf32>
    %43 = vector.broadcast %41 : vector<8x1xf32> to vector<8x128xf32>
    %44 = vector.broadcast %42 : vector<1x128xf32> to vector<8x128xf32>
    %45 = arith.mulf %43, %44 : vector<8x128xf32>
    %46 = arith.addf %40, %45 : vector<8x128xf32>
    %47 = vector.extract_strided_slice %9 {offsets = [0, 1], sizes = [8, 1], strides = [1, 1]} : vector<8x4xf32> to vector<8x1xf32>
    %c1 = arith.constant 1 : index
    %c0_15 = arith.constant 0 : index
    %48 = vector.load %arg6[%c1, %c0_15] : memref<4x128xf32, #tpu.memory_space<vmem>>, vector<1x128xf32>
    %49 = vector.broadcast %47 : vector<8x1xf32> to vector<8x128xf32>
    %50 = vector.broadcast %48 : vector<1x128xf32> to vector<8x128xf32>
    %51 = arith.mulf %49, %50 : vector<8x128xf32>
    %52 = arith.addf %46, %51 : vector<8x128xf32>
    %53 = vector.extract_strided_slice %9 {offsets = [0, 2], sizes = [8, 1], strides = [1, 1]} : vector<8x4xf32> to vector<8x1xf32>
    %c2 = arith.constant 2 : index
    %c0_16 = arith.constant 0 : index
    %54 = vector.load %arg6[%c2, %c0_16] : memref<4x128xf32, #tpu.memory_space<vmem>>, vector<1x128xf32>
    %55 = vector.broadcast %53 : vector<8x1xf32> to vector<8x128xf32>
    %56 = vector.broadcast %54 : vector<1x128xf32> to vector<8x128xf32>
    %57 = arith.mulf %55, %56 : vector<8x128xf32>
    %58 = arith.addf %52, %57 : vector<8x128xf32>
    %59 = vector.extract_strided_slice %9 {offsets = [0, 3], sizes = [8, 1], strides = [1, 1]} : vector<8x4xf32> to vector<8x1xf32>
    %c3 = arith.constant 3 : index
    %c0_17 = arith.constant 0 : index
    %60 = vector.load %arg6[%c3, %c0_17] : memref<4x128xf32, #tpu.memory_space<vmem>>, vector<1x128xf32>
    %61 = vector.broadcast %59 : vector<8x1xf32> to vector<8x128xf32>
    %62 = vector.broadcast %60 : vector<1x128xf32> to vector<8x128xf32>
    %63 = arith.mulf %61, %62 : vector<8x128xf32>
    %64 = arith.addf %58, %63 : vector<8x128xf32>
    %c0_18 = arith.constant 0 : index
    %c0_19 = arith.constant 0 : index
    %65 = vector.load %arg7[%c0_18, %c0_19] : memref<8x128xf32, #tpu.memory_space<vmem>>, vector<8x128xf32>
    tpu.vector_store %arg7[%c0_18, %c0_19], %64 {strides = array<i32>} : memref<8x128xf32, #tpu.memory_space<vmem>>, vector<8x128xf32>,
    return
  }
  func.func @transform_0(%arg0: i32) -> (i32, i32) {
    %c0_i32 = arith.constant 0 : i32
    %c0_i32_0 = arith.constant 0 : i32
    return %arg0, %c0_i32 : i32, i32
  }
  func.func @transform_1(%arg0: i32) -> (i32, i32) {
    %c0_i32 = arith.constant 0 : i32
    %c0_i32_0 = arith.constant 0 : i32
    return %arg0, %c0_i32 : i32, i32
  }
  func.func @transform_2(%arg0: i32) -> (i32, i32) {
    %c0_i32 = arith.constant 0 : i32
    %c0_i32_0 = arith.constant 0 : i32
    %c0_i32_1 = arith.constant 0 : i32
    return %c0_i32, %c0_i32_0 : i32, i32
  }
  func.func @transform_3(%arg0: i32) -> (i32, i32) {
    %c0_i32 = arith.constant 0 : i32
    %c0_i32_0 = arith.constant 0 : i32
    %c0_i32_1 = arith.constant 0 : i32
    return %c0_i32, %c0_i32_0 : i32, i32
  }
  func.func @transform_4(%arg0: i32) -> (i32, i32) {
    %c0_i32 = arith.constant 0 : i32
    %c0_i32_0 = arith.constant 0 : i32
    %c0_i32_1 = arith.constant 0 : i32
    return %c0_i32, %c0_i32_0 : i32, i32
  }
  func.func @transform_5(%arg0: i32) -> (i32, i32) {
    %c0_i32 = arith.constant 0 : i32
    %c0_i32_0 = arith.constant 0 : i32
    %c0_i32_1 = arith.constant 0 : i32
    return %c0_i32, %c0_i32_0 : i32, i32
  }
  func.func @transform_6(%arg0: i32) -> (i32, i32) {
    %c0_i32 = arith.constant 0 : i32
    %c0_i32_0 = arith.constant 0 : i32
    return %arg0, %c0_i32 : i32, i32
  }
}

</mosaic_0001>

<bundles_post_ra>
// kernel: tpu_custom_call.1
= control target key start
LH: loop header
LB: loop body
LE: loop exit
PB: predicated region body
PF: predicated region fallthrough
CT: control target
= control target key end

     0   :  { %11 = vsyncpa [#allocation3], 0  ;;  %s1626_s0 = inlined_call_operand.vmem [shape: f32[16,128], index: 0, kind: input, shape index: {}]   ;;  %s1627_s1 = inlined_call_operand.vmem [shape: f32[16,4], index: 1, kind: input, shape index: {}]   ;;  %s1628_s2 = inlined_call_operand.hbm [shape: f32[128,512], index: 2, kind: input, shape index: {}]   ;;  %s1629_s3 = inlined_call_operand.vmem [shape: f32[1,512], index: 3, kind: input, shape index: {}]   ;;  %s1630_s4 = inlined_call_operand.hbm [shape: f32[512,128], index: 4, kind: input, shape index: {}]   ;;  %s1631_s5 = inlined_call_operand.vmem [shape: f32[4,128], index: 5, kind: input, shape index: {}]   ;;  %s1632_s6 = inlined_call_operand.hbm [shape: f32[16,128], index: 6, kind: output, shape index: {}]  }
   0x1   :  { %12 = vsyncpa [#allocation6], 0 }
   0x2   :  { %13 = vsyncpa [#allocation4], 0 }
   0x3   :  { %15 = vsyncpa [#allocation4 + $0x1], 0  ;;  %s1413_s21 = smov 0   ;;  %s1415_s22 = smov 0  }
   0x4   :  { %s1417_s23 = smov 0   ;;  %s1419_s24 = smov 0  }
   0x5 LB: > { %s1434_s25 = sadd.s32 4294967295, %s1364_s24   ;;  %s924_s26 = sadd.s32 4294967294, %s1364_s24   ;;  %s1364_s24 = sphi %s1419_s24, %s1650_s24   ;;  %s1360_s23 = sphi %s1417_s23, %s1649_s23   ;;  %s1356_s22 = sphi %s1415_s22, %s1648_s22   ;;  %s1352_s21 = sphi %s1413_s21, %s1647_s21  }
   0x6   : > { %s1438_s27 = sadd.s32 1, %s1364_s24   ;;  %s164_s28 = sadd.s32 1, %s1360_s23 }
   0x7   : > { %s161_s29 = ssub.s32 %s1364_s24, %s1438_s27  ;;  %p174_p0 = scmp.ne.s32.totalorder %s1360_s23, %s1356_s22 }
   0x8   : > { %p162_p1 = scmp.eq.s32.totalorder %s161_s29, 0  ;;  %p175_p2 = scmp.eq.s32.totalorder %s1434_s25, 1 }
   0x9   : > { %p180_p3 = scmp.ne.s32.totalorder %s1356_s22, %s1352_s21  ;;  %p181_p4 = scmp.eq.s32.totalorder %s924_s26, 1 }
   0xa   : > { %s1449_s30 = scalar_select %p162_p1, %s1360_s23, %s164_s28  }
   0xb   : > { %p1451_p5 = por %p175_p2, %p174_p0  ;;  %p1455_p6 = por %p181_p4, %p180_p3 }
   0xc   : > { %p925_p7 = scmp.ge.s32.totalorder %s1364_s24, 1  ;;  %p188_p8 = scmp.lt.s32.totalorder %s1364_s24, 3 }
   0xd   : > { %s1636_s7 = scalar_select %p1451_p5, 1, 0 }
   0xe   : > { %s1637_s8 = scalar_select %p1455_p6, 1, 0 }
   0xf   : > { %p1633_p9 = scmp.eq.s32.totalorder %s1434_s25, 0  ;;  %p1462_p10 = pnand %p925_p7, %p188_p8 }
  0x10   : > { %s1366_s10 = smov [#allocation2]   ;;  %s1367_s13 = smov [#allocation5]  }
  0x11   : > { %s1638_s9 = scalar_select %p1462_p10, 1, 0 }
  0x12   : > { %s200_s11 = sshll.u32 %s1366_s10, 4  ;;  %p1155_p11 = pneg %p1462_p10  ;;  %s201_s11 = int_to_ptr.vmem [resolvable:$true] %s200_s11 }
  0x13   : > { %s216_s14 = sshll.u32 %s1367_s13, 4  ;;  %s1238_s17 = scalar_lea.hbm %s1628_s2, 8192  ;;  %s1474_s14 = int_to_ptr.vmem [resolvable:$true] %s216_s14 }
  0x14   : > { %p1470_p12 = pnand %p1633_p9, %p1155_p11  ;;  %p1239_p13 = scmp.ne.s32.totalorder %s1628_s2, %s1238_s17 }
  0x15   : > { %p1245_p3 = scmp.lt.u32.totalorder %s1238_s17, %s1628_s2 }
  0x16   : > { %p1240_p0 = pneg %p1470_p12 }
  0x18   : > { %p1241_p1 = pnand %p1240_p0, %p1239_p13 }
  0x1a   : > { %p1242_p2 = pneg %p1241_p1 }
  0x1c   : > { %p1247_p4 = pnand %p1245_p3, %p1242_p2 }
  0x1e   : > { %1250 = shalt.err (!%p1247_p4)
}
  0x1f   : > { %s1251_s28 = scalar_lea.vmem %s201_s11, 8192  ;;  %p1259_p9 = scmp.lt.s32.totalorder %s201_s11, %s201_s11 }
  0x20   : > { %p1252_p7 = scmp.ne.s32.totalorder %s201_s11, %s1251_s28  ;;  %p1260_p6 = scmp.lt.s32.totalorder %s1251_s28, %s1251_s28 }
  0x22   : > { %p1254_p8 = pnand %p1252_p7, %p1240_p0  ;;  %p1261_p5 = por %p1260_p6, %p1259_p9 }
  0x24   : > { %p1255_p11 = pneg %p1254_p8 }
  0x26   : > { %p1262_p10 = pnand %p1261_p5, %p1255_p11 }
  0x28   : > { %1265 = shalt.err (!%p1262_p10)
}
  0x29   : > { %s1368_s29 = smov 512   ;;  %s1369_s10 = smov 32  }
  0x2a   : > { %1158 = dma.hbm_to_vmem [thread:$0]  (!%p1470_p12), %s1628_s2, 8192, %s201_s11, [#allocation3], %s1368_s29, %s1368_s29, %s1369_s10  }
  0x2b   : > { %s1266_s18 = scalar_lea.hbm %s1630_s4, 8192 }
  0x2c   : > { %p1267_p13 = scmp.ne.s32.totalorder %s1630_s4, %s1266_s18  ;;  %p1273_p9 = scmp.lt.u32.totalorder %s1266_s18, %s1630_s4 }
  0x2e   : > { %p1269_p5 = pnand %p1267_p13, %p1240_p0 }
  0x30   : > { %p1270_p6 = pneg %p1269_p5 }
  0x32   : > { %p1275_p10 = pnand %p1273_p9, %p1270_p6 }
  0x34   : > { %1278 = shalt.err (!%p1275_p10)
}
  0x35   : > { %s1279_s11 = scalar_lea.vmem %s1474_s14, 8192  ;;  %p1287_p4 = scmp.lt.s32.totalorder %s1474_s14, %s1474_s14 }
  0x36   : > { %p1280_p1 = scmp.ne.s32.totalorder %s1474_s14, %s1279_s11  ;;  %p1288_p7 = scmp.lt.s32.totalorder %s1279_s11, %s1279_s11 }
  0x38   : > { %p1282_p2 = pnand %p1280_p1, %p1240_p0  ;;  %p1289_p8 = por %p1288_p7, %p1287_p4 }
  0x3a   : > { %p1283_p3 = pneg %p1282_p2 }
  0x3c   : > { %p1290_p11 = pnand %p1289_p8, %p1283_p3 }
  0x3e   : > { %1293 = shalt.err (!%p1290_p11)
}
  0x3f   : > { %s1370_s29 = smov 128   ;;  %s1371_s10 = smov 8  }
  0x40   : > { %1161 = dma.hbm_to_vmem [thread:$0]  (!%p1470_p12), %s1630_s4, 8192, %s1474_s14, [#allocation6], %s1370_s29, %s1370_s29, %s1371_s10  }
  0x41   : > { %p1640_p13 = scmp.ne.s32.totalorder %s1638_s9, 0 }
  0x42   : > { %p1641_p0 = scmp.eq.s32.totalorder (!%p1640_p13), %s1434_s25, 0 }
  0x43   : > { %249 = sbr.rel (%p1640_p13) target bundleno = 776 (0x308), region = 44 }
  0x4a   : > { %1339 = dma.done.wait (%p1641_p0), [#allocation3], 8192   ;;  %p1642_p5 = pmov %p1641_p0 }
  0x4b   : > { %p1643_p6 = pmov %p1641_p0 }
  0x4c   : > { %1341 = vsyncadd (%p1642_p5), [#allocation3], 4294959104 }
  0x4d   : > { %1343 = dma.done.wait (%p1643_p6), [#allocation6], 8192   ;;  %p1644_p9 = pmov %p1641_p0 }
  0x4e   : > { %p286_p10 = scmp.lt.s32.totalorder %s1434_s25, 1  ;;  %vm295_vm0 = vcmask 31744   ;;  %v309_v2 = vld [vmem:[#allocation2 + $0x8] sm:$0xff]  ;;  %v308_v5 = vld [vmem:[#allocation2] sm:$0xff]  ;;  %v311_v8 = vld [vmem:[#allocation2 + $0x18] sm:$0xff]  ;;  %v1372_v54 = vmov 0.0  }
  0x4f   : > { %1345 = vsyncadd (%p1644_p9), [#allocation6], 4294959104  ;;  %v313_v3 = vld [vmem:[#allocation2 + $0x28] sm:$0xff]  ;;  %v312_v6 = vld [vmem:[#allocation2 + $0x20] sm:$0xff]  ;;  %458 = vmatprep.mubr.f32.mxu0 %v1372_v54  ;;  %529 = vmatprep.mubr.f32.mxu1 %v1372_v54  ;;  %s283_s10 = sand.u32 1, %s1356_s22   ;;  %s944_s18 = sshll.u32 %s1434_s25, 7 }
  0x50   : > { %s1535_s12 = scalar_select %p286_p10, %s1434_s25, 1  ;;  %v1017_v4 = vpack.c.bf16 %v313_v3, %v309_v2  ;;  %v1019_v7 = vpack.c.bf16 %v312_v6, %v308_v5  ;;  %v315_v9 = vld [vmem:[#allocation2 + $0x38] sm:$0xff]  ;;  %v310_v11 = vld [vmem:[#allocation2 + $0x10] sm:$0xff]  ;;  %v317_v13 = vld [vmem:[#allocation2 + $0x48] sm:$0xff] }
  0x51   : > { %v1049_v10 = vpack.c.bf16 %v315_v9, %v311_v8  ;;  %v314_v12 = vld [vmem:[#allocation2 + $0x30] sm:$0xff]  ;;  %v321_v15 = vld [vmem:[#allocation2 + $0x68] sm:$0xff]  ;;  %v316_v16 = vld [vmem:[#allocation2 + $0x40] sm:$0xff]  ;;  %s1584_s11 = scalar_lea.hbm %s1632_s6, %s944_s18  ;;  %s818_s29 = scalar_lea.sflag [#allocation4], %s283_s10 }
  0x52   : > { %s933_s9 = sshll.u32 %s1535_s12, 3  ;;  %1018 = vmatprep.subr.bf16.mxu0 %v1017_v4  ;;  %v1051_v14 = vpack.c.bf16 %v314_v12, %v310_v11  ;;  %v320_v17 = vld [vmem:[#allocation2 + $0x60] sm:$0xff]  ;;  %v1021_v18 = vpack.c.bf16 %v321_v15, %v317_v13  ;;  %v319_v20 = vld [vmem:[#allocation2 + $0x58] sm:$0xff]  ;;  %v318_v22 = vld [vmem:[#allocation2 + $0x50] sm:$0xff]  ;;  %s932_s12 = sshll.u32 %s283_s10, 3 }
  0x53   : > { %s293_s17 = scalar_lea.vmem %s1627_s1, %s933_s9  ;;  %1020 = vmatpush1.bf16.msra.mxu0 %v1019_v7  ;;  %1050 = vmatprep.subr.bf16.mxu1 %v1049_v10  ;;  %v1023_v19 = vpack.c.bf16 %v320_v17, %v316_v16  ;;  %v323_v21 = vld [vmem:[#allocation2 + $0x78] sm:$0xff]  ;;  %v322_v24 = vld [vmem:[#allocation2 + $0x70] sm:$0xff]  ;;  %v325_v25 = vld [vmem:[#allocation2 + $0x88] sm:$0xff]  ;;  %s289_s20 = scalar_lea.vmem %s1626_s0, %s933_s9 }
  0x54   : > { %v1543_v0 = vld [vmem:[%s293_s17] sm:$0xff]  ;;  %1052 = vmatpush1.bf16.msra.mxu1 %v1051_v14  ;;  %v1053_v23 = vpack.c.bf16 %v323_v21, %v319_v20  ;;  %v329_v26 = vld [vmem:[#allocation2 + $0xa8] sm:$0xff]  ;;  %1022 = vmatprep.subr.bf16.mxu0 %v1021_v18  ;;  %v1055_v27 = vpack.c.bf16 %v322_v24, %v318_v22  ;;  %v327_v31 = vld [vmem:[#allocation2 + $0x98] sm:$0xff]  ;;  %s285_s19 = scalar_lea.vmem [#allocation7], %s932_s12  ;;  %p1645_p1 = scmp.ne.s32.totalorder %s1636_s7, 0 }
  0x55   : > { %v296_v1 = vsel %vm295_vm0, %v1543_v0, -inf  ;;  %v1025_v28 = vpack.c.bf16 %v329_v26, %v325_v25  ;;  %v324_v29 = vld [vmem:[#allocation2 + $0x80] sm:$0xff]  ;;  %v331_v33 = vld [vmem:[#allocation2 + $0xb8] sm:$0xff]  ;;  %v326_v34 = vld [vmem:[#allocation2 + $0x90] sm:$0xff]  ;;  %s1377_s25 = smov [#allocation7]  }
  0x56   : > { %297 = vmax.xlane.f32.xlu0 %v296_v1  ;;  %v328_v30 = vld [vmem:[#allocation2 + $0xa0] sm:$0xff]  ;;  %1054 = vmatprep.subr.bf16.mxu1 %v1053_v23  ;;  %v330_v35 = vld [vmem:[#allocation2 + $0xb0] sm:$0xff]  ;;  %v1057_v36 = vpack.c.bf16 %v331_v33, %v327_v31  ;;  %v333_v37 = vld [vmem:[#allocation2 + $0xc8] sm:$0xff]  ;;  %s1298_s15 = sshll.u32 %s1377_s25, 4  ;;  %s1299_s15 = int_to_ptr.vmem [resolvable:$false] %s1298_s15 }
  0x57   : > { %1024 = vmatpush1.bf16.msra.mxu0 %v1023_v19  ;;  %v1027_v32 = vpack.c.bf16 %v328_v30, %v324_v29  ;;  %v337_v38 = vld [vmem:[#allocation2 + $0xe8] sm:$0xff]  ;;  %v1059_v39 = vpack.c.bf16 %v330_v35, %v326_v34  ;;  %v332_v41 = vld [vmem:[#allocation2 + $0xc0] sm:$0xff]  ;;  %v335_v44 = vld [vmem:[#allocation2 + $0xd8] sm:$0xff]  ;;  %s1300_s12 = scalar_lea.vmem %s1299_s15, 256 }
  0x58   : > { %1026 = vmatprep.subr.bf16.mxu0 %v1025_v28  ;;  %1056 = vmatpush1.bf16.msra.mxu1 %v1055_v27  ;;  %v1029_v40 = vpack.c.bf16 %v337_v38, %v333_v37  ;;  %v336_v42 = vld [vmem:[#allocation2 + $0xe0] sm:$0xff]  ;;  %v339_v45 = vld [vmem:[#allocation2 + $0xf8] sm:$0xff]  ;;  %v334_v47 = vld [vmem:[#allocation2 + $0xd0] sm:$0xff] }
  0x59   : > { %1058 = vmatprep.subr.bf16.mxu1 %v1057_v36  ;;  %v1031_v43 = vpack.c.bf16 %v336_v42, %v332_v41  ;;  %v1061_v46 = vpack.c.bf16 %v339_v45, %v335_v44  ;;  %v338_v48 = vld [vmem:[#allocation2 + $0xf0] sm:$0xff]  ;;  %v341_v49 = vld [vmem:[#allocation2 + $0x108] sm:$0xff]  ;;  %v340_v52 = vld [vmem:[#allocation2 + $0x100] sm:$0xff]  ;;  %v1373_v42 = vmov 3  }
  0x5a   : > { %v1063_v50 = vpack.c.bf16 %v338_v48, %v334_v47  ;;  %v345_v51 = vld [vmem:[#allocation2 + $0x128] sm:$0xff]  ;;  %v344_v53 = vld [vmem:[#allocation2 + $0x120] sm:$0xff]  ;;  %v343_v57 = vld [vmem:[#allocation2 + $0x118] sm:$0xff]  ;;  %1216 = vset.pattern.permute.xlu0 %v1373_v42 }
  0x5b   : > { %1028 = vmatpush1.bf16.msra.mxu0 %v1027_v32  ;;  %v1033_v55 = vpack.c.bf16 %v345_v51, %v341_v49  ;;  %v1035_v56 = vpack.c.bf16 %v344_v53, %v340_v52  ;;  %v347_v58 = vld [vmem:[#allocation2 + $0x138] sm:$0xff]  ;;  %v342_v59 = vld [vmem:[#allocation2 + $0x110] sm:$0xff]  ;;  %v349_v62 = vld [vmem:[#allocation2 + $0x148] sm:$0xff] }
  0x5c   : > { %1030 = vmatprep.subr.bf16.mxu0 %v1029_v40  ;;  %1060 = vmatpush1.bf16.msra.mxu1 %v1059_v39  ;;  %v1065_v60 = vpack.c.bf16 %v347_v58, %v343_v57  ;;  %v346_v61 = vld [vmem:[#allocation2 + $0x130] sm:$0xff]  ;;  %v353_v63 = vld [vmem:[#allocation2 + $0x168] sm:$0xff]  ;;  %v348_v3 = vld [vmem:[#allocation2 + $0x140] sm:$0xff] }
  0x5d   : > { %1062 = vmatprep.subr.bf16.mxu1 %v1061_v46  ;;  %v1067_v1 = vpack.c.bf16 %v346_v61, %v342_v59  ;;  %v1037_v2 = vpack.c.bf16 %v353_v63, %v349_v62  ;;  %v352_v4 = vld [vmem:[#allocation2 + $0x160] sm:$0xff]  ;;  %v351_v5 = vld [vmem:[#allocation2 + $0x158] sm:$0xff]  ;;  %v350_v8 = vld [vmem:[#allocation2 + $0x150] sm:$0xff] }
  0x5e   : > { %v1039_v6 = vpack.c.bf16 %v352_v4, %v348_v3  ;;  %v355_v7 = vld [vmem:[#allocation2 + $0x178] sm:$0xff]  ;;  %v354_v9 = vld [vmem:[#allocation2 + $0x170] sm:$0xff]  ;;  %v357_v11 = vld [vmem:[#allocation2 + $0x188] sm:$0xff] }
  0x5f   : > { %1032 = vmatpush1.bf16.msra.mxu0 %v1031_v43  ;;  %v1069_v10 = vpack.c.bf16 %v355_v7, %v351_v5  ;;  %v361_v12 = vld [vmem:[#allocation2 + $0x1a8] sm:$0xff]  ;;  %v356_v13 = vld [vmem:[#allocation2 + $0x180] sm:$0xff]  ;;  %v1071_v14 = vpack.c.bf16 %v354_v9, %v350_v8  ;;  %v359_v17 = vld [vmem:[#allocation2 + $0x198] sm:$0xff]  ;;  %v1374_v43 = vmov 1  }
  0x60   : > { %1064 = vmatpush1.bf16.msra.mxu1 %v1063_v50  ;;  %1034 = vmatprep.subr.bf16.mxu0 %v1033_v55  ;;  %v1041_v15 = vpack.c.bf16 %v361_v12, %v357_v11  ;;  %v360_v16 = vld [vmem:[#allocation2 + $0x1a0] sm:$0xff]  ;;  %v363_v18 = vld [vmem:[#allocation2 + $0x1b8] sm:$0xff]  ;;  %v358_v20 = vld [vmem:[#allocation2 + $0x190] sm:$0xff] }
  0x61   : > { %1066 = vmatprep.subr.bf16.mxu1 %v1065_v60  ;;  %v1073_v19 = vpack.c.bf16 %v363_v18, %v359_v17  ;;  %v362_v21 = vld [vmem:[#allocation2 + $0x1b0] sm:$0xff]  ;;  %v365_v22 = vld [vmem:[#allocation2 + $0x1c8] sm:$0xff]  ;;  %v1043_v23 = vpack.c.bf16 %v360_v16, %v356_v13  ;;  %v364_v25 = vld [vmem:[#allocation2 + $0x1c0] sm:$0xff]  ;;  %1214 = vset.pattern.permute.xlu1 %v1374_v43 }
  0x62   : > { %v369_v24 = vld [vmem:[#allocation2 + $0x1e8] sm:$0xff]  ;;  %v368_v27 = vld [vmem:[#allocation2 + $0x1e0] sm:$0xff]  ;;  %v367_v28 = vld [vmem:[#allocation2 + $0x1d8] sm:$0xff]  ;;  %v1075_v30 = vpack.c.bf16 %v362_v21, %v358_v20 }
  0x63   : > { %1036 = vmatpush1.bf16.msra.mxu0 %v1035_v56  ;;  %v1045_v26 = vpack.c.bf16 %v369_v24, %v365_v22  ;;  %v371_v29 = vld [vmem:[#allocation2 + $0x1f8] sm:$0xff]  ;;  %v366_v32 = vld [vmem:[#allocation2 + $0x1d0] sm:$0xff]  ;;  %v1047_v34 = vpack.c.bf16 %v368_v27, %v364_v25  ;;  %v307_v36 = vld [vmem:[%s289_s20] sm:$0xff]  ;;  %s831_s20 = sshll.u32 %s285_s19, 4  ;;  %s1586_s20 = int_to_ptr.vmem [resolvable:$true] %s831_s20 }
  0x64   : > { %1038 = vmatprep.subr.bf16.mxu0 %v1037_v2  ;;  %1068 = vmatpush1.bf16.msra.mxu1 %v1067_v1  ;;  %v1077_v31 = vpack.c.bf16 %v371_v29, %v367_v28  ;;  %v370_v33 = vld [vmem:[#allocation2 + $0x1f0] sm:$0xff]  ;;  %v601_v44 = vld [vmem:[#allocation5 + $0x80] sm:$0xff]  ;;  %v602_v45 = vld [vmem:[#allocation5 + $0x88] sm:$0xff]  ;;  %s1294_s13 = scalar_lea.vmem %s1586_s20, 128  ;;  %p1301_p4 = scmp.lt.s32.totalorder %s1586_s20, %s1299_s15 }
  0x65   : > { %1070 = vmatprep.subr.bf16.mxu1 %v1069_v10  ;;  %v1079_v35 = vpack.c.bf16 %v370_v33, %v366_v32  ;;  %v1081_v46 = vpack.c.bf16 %v602_v45, %v601_v44  ;;  %v585_v47 = vld [vmem:[#allocation5] sm:$0xff]  ;;  %v586_v48 = vld [vmem:[#allocation5 + $0x8] sm:$0xff]  ;;  %v603_v49 = vld [vmem:[#allocation5 + $0x90] sm:$0xff]  ;;  %p1295_p12 = scmp.ne.s32.totalorder %s1586_s20, %s1294_s13  ;;  %p1302_p7 = scmp.lt.s32.totalorder %s1300_s12, %s1294_s13 }
  0x66   : > { %v1083_v50 = vpack.c.bf16 %v586_v48, %v585_v47  ;;  %v587_v51 = vld [vmem:[#allocation5 + $0x10] sm:$0xff]  ;;  %v588_v52 = vld [vmem:[#allocation5 + $0x18] sm:$0xff]  ;;  %v633_v54 = vld [vmem:[#allocation5 + $0x180] sm:$0xff] }
  0x67   : > { %1040 = vmatpush1.bf16.msra.mxu0 %v1039_v6  ;;  %v634_v55 = vld [vmem:[#allocation5 + $0x188] sm:$0xff]  ;;  %v617_v56 = vld [vmem:[#allocation5 + $0x100] sm:$0xff]  ;;  %v1087_v57 = vpack.c.bf16 %v588_v52, %v587_v51  ;;  %v635_v2 = vld [vmem:[#allocation5 + $0x190] sm:$0xff]  ;;  %p1296_p2 = pnand %p1295_p12, %p1645_p1  ;;  %p1303_p8 = por %p1302_p7, %p1301_p4 }
  0x68   : > { %1042 = vmatprep.subr.bf16.mxu0 %v1041_v15  ;;  %1072 = vmatpush1.bf16.msra.mxu1 %v1071_v14  ;;  %v618_v58 = vld [vmem:[#allocation5 + $0x108] sm:$0xff]  ;;  %v605_v59 = vld [vmem:[#allocation5 + $0xa0] sm:$0xff]  ;;  %v1113_v60 = vpack.c.bf16 %v634_v55, %v633_v54  ;;  %v636_v3 = vld [vmem:[#allocation5 + $0x198] sm:$0xff] }
  0x69   : > { %1074 = vmatprep.subr.bf16.mxu1 %v1073_v19  ;;  %v1115_v61 = vpack.c.bf16 %v618_v58, %v617_v56  ;;  %v606_v62 = vld [vmem:[#allocation5 + $0xa8] sm:$0xff]  ;;  %v589_v63 = vld [vmem:[#allocation5 + $0x20] sm:$0xff]  ;;  %v619_v4 = vld [vmem:[#allocation5 + $0x110] sm:$0xff]  ;;  %v1117_v6 = vpack.c.bf16 %v636_v3, %v635_v2  ;;  %p1297_p3 = pneg %p1296_p2 }
  0x6a   : > { %v590_v1 = vld [vmem:[#allocation5 + $0x28] sm:$0xff]  ;;  %v1089_v5 = vpack.c.bf16 %v606_v62, %v605_v59  ;;  %v620_v7 = vld [vmem:[#allocation5 + $0x118] sm:$0xff]  ;;  %v607_v8 = vld [vmem:[#allocation5 + $0xb0] sm:$0xff] }
  0x6b   : > { %1044 = vmatpush1.bf16.msra.mxu0 %v1043_v23  ;;  %v608_v9 = vld [vmem:[#allocation5 + $0xb8] sm:$0xff]  ;;  %v1091_v10 = vpack.c.bf16 %v590_v1, %v589_v63  ;;  %v1119_v11 = vpack.c.bf16 %v620_v7, %v619_v4  ;;  %v591_v12 = vld [vmem:[#allocation5 + $0x30] sm:$0xff]  ;;  %v637_v14 = vld [vmem:[#allocation5 + $0x1a0] sm:$0xff]  ;;  %p1304_p11 = pnand %p1303_p8, %p1297_p3 }
  0x6c   : > { %1046 = vmatprep.subr.bf16.mxu0 %v1045_v26  ;;  %1076 = vmatpush1.bf16.msra.mxu1 %v1075_v30  ;;  %v592_v13 = vld [vmem:[#allocation5 + $0x38] sm:$0xff]  ;;  %v1093_v15 = vpack.c.bf16 %v608_v9, %v607_v8  ;;  %v638_v16 = vld [vmem:[#allocation5 + $0x1a8] sm:$0xff]  ;;  %v621_v17 = vld [vmem:[#allocation5 + $0x120] sm:$0xff] }
  0x6d   : > { %1078 = vmatprep.subr.bf16.mxu1 %v1077_v31  ;;  %v622_v18 = vld [vmem:[#allocation5 + $0x128] sm:$0xff]  ;;  %v1121_v19 = vpack.c.bf16 %v638_v16, %v637_v14  ;;  %v609_v20 = vld [vmem:[#allocation5 + $0xc0] sm:$0xff]  ;;  %v639_v22 = vld [vmem:[#allocation5 + $0x1b0] sm:$0xff]  ;;  %v1095_v24 = vpack.c.bf16 %v592_v13, %v591_v12  ;;  %v1375_v12 = vmov 0  }
  0x6e   : > { %v610_v21 = vld [vmem:[#allocation5 + $0xc8] sm:$0xff]  ;;  %v640_v23 = vld [vmem:[#allocation5 + $0x1b8] sm:$0xff]  ;;  %v1123_v25 = vpack.c.bf16 %v622_v18, %v621_v17  ;;  %v593_v26 = vld [vmem:[#allocation5 + $0x40] sm:$0xff] }
  0x6f   : > { %1048 = vmatpush1.bf16.msra.mxu0 %v1047_v34  ;;  %v594_v27 = vld [vmem:[#allocation5 + $0x48] sm:$0xff]  ;;  %v1097_v28 = vpack.c.bf16 %v610_v21, %v609_v20  ;;  %v1125_v29 = vpack.c.bf16 %v640_v23, %v639_v22  ;;  %v623_v30 = vld [vmem:[#allocation5 + $0x130] sm:$0xff]  ;;  %v624_v31 = vld [vmem:[#allocation5 + $0x138] sm:$0xff]  ;;  %v1376_v20 = vmov 2   ;;  %v374_v21 = vlaneseq }
  0x70   : > { %1080 = vmatpush1.bf16.msra.mxu1 %v1079_v35  ;;  %1082 = vmatprep.subr.bf16.mxu0 %v1081_v46  ;;  %v611_v32 = vld [vmem:[#allocation5 + $0xd0] sm:$0xff]  ;;  %v612_v33 = vld [vmem:[#allocation5 + $0xd8] sm:$0xff]  ;;  %v641_v34 = vld [vmem:[#allocation5 + $0x1c0] sm:$0xff] }
  0x71   : > { %1114 = vmatprep.subr.bf16.mxu1 %v1113_v60  ;;  %v642_v35 = vld [vmem:[#allocation5 + $0x1c8] sm:$0xff]  ;;  %v625_v43 = vld [vmem:[#allocation5 + $0x140] sm:$0xff]  ;;  %v644_v60 = vld [vmem:[#allocation5 + $0x1d8] sm:$0xff]  ;;  %v375_v22 = vshrl.u32 %v374_v21, 7 }
  0x72   : > { %459 = vmatmul.mubr.f32.vlgmr.msra.gmra.mrb[0].mxu0 %v307_v36  ;;  %v1129_v42 = vpack.c.bf16 %v642_v35, %v641_v34  ;;  %v626_v44 = vld [vmem:[#allocation5 + $0x148] sm:$0xff]  ;;  %v613_v45 = vld [vmem:[#allocation5 + $0xe0] sm:$0xff]  ;;  %v628_v62 = vld [vmem:[#allocation5 + $0x158] sm:$0xff] }
  0x73   : > { %530 = vmatmul.mubr.f32.vlgmr.msra.gmra.mrb[0].mxu1 %v307_v36  ;;  %1084 = vmatpush3.bf16.msra.mxu0 %v1083_v50  ;;  %v1099_v36 = vpack.c.bf16 %v594_v27, %v593_v26  ;;  %v614_v46 = vld [vmem:[#allocation5 + $0xe8] sm:$0xff]  ;;  %v1131_v48 = vpack.c.bf16 %v626_v44, %v625_v43  ;;  %v597_v55 = vld [vmem:[#allocation5 + $0x60] sm:$0xff]  ;;  %v615_v2 = vld [vmem:[#allocation5 + $0xf0] sm:$0xff]  ;;  %v380_v23 = vsub.s32 1, %v375_v22 }
  0x74   : > { %1116 = vmatpush3.bf16.msra.mxu1 %v1115_v61  ;;  %v598_v56 = vld [vmem:[#allocation5 + $0x68] sm:$0xff]  ;;  %v627_v61 = vld [vmem:[#allocation5 + $0x150] sm:$0xff]  ;;  %v616_v3 = vld [vmem:[#allocation5 + $0xf8] sm:$0xff] }
  0x75   : > { %1118 = vmatprep.subr.bf16.mxu1 %v1117_v6  ;;  %v1107_v59 = vpack.c.bf16 %v598_v56, %v597_v55  ;;  %v1135_v1 = vpack.c.bf16 %v628_v62, %v627_v61  ;;  %v1109_v4 = vpack.c.bf16 %v616_v3, %v615_v2  ;;  %v600_v6 = vld [vmem:[#allocation5 + $0x78] sm:$0xff]  ;;  %v645_v7 = vld [vmem:[#allocation5 + $0x1e0] sm:$0xff]  ;;  %v646_v9 = vld [vmem:[#allocation5 + $0x1e8] sm:$0xff] }
  0x76   : > { %v647_v14 = vld [vmem:[#allocation5 + $0x1f0] sm:$0xff]  ;;  %v632_v18 = vld [vmem:[#allocation5 + $0x178] sm:$0xff] }
  0x77   : > { %v631_v17 = vld [vmem:[#allocation5 + $0x170] sm:$0xff] }
  0x78   : > { %1120 = vmatpush3.bf16.msra.mxu1 %v1119_v11  ;;  %v630_v11 = vld [vmem:[#allocation5 + $0x168] sm:$0xff] }
  0x79   : > { %1122 = vmatprep.subr.bf16.mxu1 %v1121_v19  ;;  %v1143_v19 = vpack.c.bf16 %v632_v18, %v631_v17 }
  0x7c   : > { %1124 = vmatpush3.bf16.msra.mxu1 %v1123_v25  ;;  %v388_v25 = vsub.s32 3, %v375_v22 }
  0x7d   : > { %1126 = vmatprep.subr.bf16.mxu1 %v1125_v29 }
  0xe3   : > { %v298_v37 = vpop.xlane.xlu0 %297 }
  0xe4   : > { %v299_v38 = vsub.f32 %v1543_v0, %v298_v37  ;;  %v604_v0 = vld [vmem:[#allocation5 + $0x98] sm:$0xff]  ;;  %v1127_v37 = vpack.c.bf16 %v624_v31, %v623_v30 }
  0xe5   : > { %v1085_v53 = vpack.c.bf16 %v604_v0, %v603_v49  ;;  %v1105_v49 = vpack.c.bf16 %v614_v46, %v613_v45 }
  0xe6   : > { %v300_v39 = vmul.f32 1.442695, %v299_v38  ;;  %v595_v38 = vld [vmem:[#allocation5 + $0x50] sm:$0xff]  ;;  %1128 = vmatpush3.bf16.msra.mxu1 %v1127_v37 }
  0xe7   : > { %1086 = vmatprep.subr.bf16.mxu0 %v1085_v53  ;;  %1130 = vmatprep.subr.bf16.mxu1 %v1129_v42 }
  0xe8   : > { %1218 = vpow2.f32 %v300_v39  ;;  %1088 = vmatpush3.bf16.msra.mxu0 %v1087_v57  ;;  %v1101_v39 = vpack.c.bf16 %v612_v33, %v611_v32  ;;  %v643_v57 = vld [vmem:[#allocation5 + $0x1d0] sm:$0xff]  ;;  %v384_v32 = vsub.s32 2, %v375_v22 }
  0xe9   : > { %1090 = vmatprep.subr.bf16.mxu0 %v1089_v5  ;;  %v1133_v63 = vpack.c.bf16 %v644_v60, %v643_v57  ;;  %v599_v5 = vld [vmem:[#allocation5 + $0x70] sm:$0xff] }
  0xea   : > { %1132 = vmatpush3.bf16.msra.mxu1 %v1131_v48  ;;  %v1111_v8 = vpack.c.bf16 %v600_v6, %v599_v5 }
  0xeb   : > { %1134 = vmatprep.subr.bf16.mxu1 %v1133_v63 }
  0xec   : > { %1092 = vmatpush3.bf16.msra.mxu0 %v1091_v10  ;;  %v1137_v10 = vpack.c.bf16 %v646_v9, %v645_v7 }
  0xed   : > { %1094 = vmatprep.subr.bf16.mxu0 %v1093_v15  ;;  %v648_v15 = vld [vmem:[#allocation5 + $0x1f8] sm:$0xff] }
  0xee   : > { %1136 = vmatpush3.bf16.msra.mxu1 %v1135_v1  ;;  %v1141_v16 = vpack.c.bf16 %v648_v15, %v647_v14  ;;  %v939_v1 = vld [vmem:[%s1631_s5] ss:$0 sm:$0xff] }
  0xef   : > { %1138 = vmatprep.subr.bf16.mxu1 %v1137_v10  ;;  %v941_v10 = vld [vmem:[%s1631_s5 + $0x2] ss:$0 sm:$0xff] }
  0xf0   : > { %1096 = vmatpush3.bf16.msra.mxu0 %v1095_v24  ;;  %v372_v24 = vld [vmem:[%s1629_s3] sm:$0xf] }
  0xf1   : > { %1098 = vmatprep.subr.bf16.mxu0 %v1097_v28  ;;  %v381_v26 = vrot.slane %v372_v24, %v380_v23  ;;  %v389_v27 = vrot.slane %v372_v24, %v388_v25  ;;  %v376_v28 = vsub.s32 0, %v375_v22 }
  0xf2   : > { %v1553_v40 = vpop.eup %1218 }
  0xf3   : > { %v302_v41 = vsel %vm295_vm0, %v1553_v40, 0.0  ;;  %v377_v31 = vrot.slane %v372_v24, %v376_v28 }
  0xf4   : > { %303 = vadd.xlane.f32.xlu0 %v302_v41  ;;  %v596_v41 = vld [vmem:[#allocation5 + $0x58] sm:$0xff]  ;;  %1100 = vmatpush3.bf16.msra.mxu0 %v1099_v36  ;;  %v385_v36 = vrot.slane %v372_v24, %v384_v32 }
  0xf5   : > { %v1103_v47 = vpack.c.bf16 %v596_v41, %v595_v38  ;;  %1102 = vmatprep.subr.bf16.mxu0 %v1101_v39 }
  0xf8   : > { %1104 = vmatpush3.bf16.msra.mxu0 %v1103_v47 }
  0xf9   : > { %1106 = vmatprep.subr.bf16.mxu0 %v1105_v49 }
  0xfc   : > { %1108 = vmatpush3.bf16.msra.mxu0 %v1107_v59 }
  0xfd   : > { %1110 = vmatprep.subr.bf16.mxu0 %v1109_v4 }
 0x100   : > { %1112 = vmatpush3.bf16.msra.mxu0 %v1111_v8  ;;  %v940_v8 = vld [vmem:[%s1631_s5 + $0x1] ss:$0 sm:$0xff] }
 0x145   : > { %v1557_v50 = vpop.f32.mrb[0].mxu0 }
 0x146   : > { %v462_v0 = vpop.f32.mrb[1].mxu0  ;;  %v1559_v51 = vpop.f32.mrb[0].mxu1  ;;  %v461_v35 = vadd.f32 %v1557_v50, %v377_v31 }
 0x147   : > { %v533_v52 = vpop.f32.mrb[1].mxu1  ;;  %v463_v29 = vadd.f32 %v462_v0, %v381_v26  ;;  %v532_v38 = vadd.f32 %v1559_v51, %v385_v36 }
 0x148   : > { %v534_v30 = vadd.f32 %v533_v52, %v389_v27  ;;  %v935_v37 = vmul.f32 -1.442695, %v461_v35 }
 0x149   : > { %v936_v33 = vmul.f32 -1.442695, %v463_v29  ;;  %v937_v39 = vmul.f32 -1.442695, %v532_v38 }
 0x14a   : > { %v938_v34 = vmul.f32 -1.442695, %v534_v30 }
 0x181   : > { %v304_v53 = vpop.xlane.xlu0 %303 }
 0x182   : > { %1220 = vrcp.f32 %v304_v53 }
 0x183   : > { %1222 = vpow2.f32 %v936_v33 }
 0x184   : > { %1224 = vpow2.f32 %v938_v34 }
 0x185   : > { %1226 = vpow2.f32 %v935_v37 }
 0x186   : > { %1228 = vpow2.f32 %v937_v39 }
 0x18c   : > { %v1221_v54 = vpop.eup %1220 }
 0x18d   : > { %v306_v58 = vmul.f32 %v1221_v54, %v1553_v40  ;;  %v629_v40 = vld [vmem:[#allocation5 + $0x160] sm:$0xff]  ;;  %v1223_v41 = vpop.eup %1222 }
 0x18e   : > { %v1139_v13 = vpack.c.bf16 %v630_v11, %v629_v40  ;;  %v1225_v42 = vpop.eup %1224  ;;  %v549_v43 = vadd.f32 1.0, %v1223_v41 }
 0x18f   : > { %581 = vperm.xlu0 %1216, %v306_v58   ;;  %571 = vperm.xlu1 %1214, %v306_v58   ;;  %v551_v44 = vadd.f32 1.0, %v1225_v42  ;;  %v1227_v45 = vpop.eup %1226 }
 0x190   : > { %1140 = vmatpush3.bf16.msra.mxu1 %v1139_v13  ;;  %1230 = vrcp.f32 %v549_v43  ;;  %v548_v46 = vadd.f32 1.0, %v1227_v45  ;;  %v1229_v47 = vpop.eup %1228  ;;  %v942_v13 = vld [vmem:[%s1631_s5 + $0x3] ss:$0 sm:$0xff] }
 0x191   : > { %1142 = vmatprep.subr.bf16.mxu1 %v1141_v16  ;;  %1232 = vrcp.f32 %v551_v44  ;;  %v550_v48 = vadd.f32 1.0, %v1229_v47 }
 0x192   : > { %1234 = vrcp.f32 %v548_v46 }
 0x193   : > { %1215 = vset.pattern.permute.xlu1 %v1375_v12  ;;  %1236 = vrcp.f32 %v550_v48 }
 0x194   : > { %566 = vperm.xlu1 %1215, %v306_v58   ;;  %1144 = vmatpush3.bf16.msra.mxu1 %v1143_v19 }
 0x198   : > { %1217 = vset.pattern.permute.xlu1 %v1376_v20 }
 0x199   : > { %576 = vperm.xlu1 %1217, %v306_v58  }
 0x19a   : > { %v1231_v49 = vpop.eup %1230 }
 0x19b   : > { %v1233_v50 = vpop.eup %1232  ;;  %v561_v0 = vmul.f32 %v1231_v49, %v463_v29 }
 0x19c   : > { %v563_v52 = vmul.f32 %v1233_v50, %v534_v30  ;;  %v1235_v54 = vpop.eup %1234 }
 0x19d   : > { %v560_v57 = vmul.f32 %v1235_v54, %v461_v35  ;;  %v1237_v59 = vpop.eup %1236 }
 0x19e   : > { %v562_v61 = vmul.f32 %v1237_v59, %v532_v38 }
 0x20e   : > { %v582_v51 = vpop.permute.xlu0 %581  ;;  %v572_v53 = vpop.permute.xlu1 %571 }
 0x20f   : > { %v584_v55 = vmul.f32 %v582_v51, %v563_v52  ;;  %v574_v56 = vmul.f32 %v572_v53, %v561_v0  ;;  %v800_v11 = vmul.f32 %v940_v8, %v572_v53  ;;  %v814_v16 = vmul.f32 %v942_v13, %v582_v51 }
 0x211   : > { %719 = vmatprep.mubr.f32.mxu0 %v574_v56  ;;  %789 = vmatprep.mubr.f32.mxu1 %v584_v55 }
 0x213   : > { %v567_v58 = vpop.permute.xlu1 %566 }
 0x214   : > { %v569_v60 = vmul.f32 %v567_v58, %v560_v57  ;;  %v654_v4 = vmul.f32 %v939_v1, %v567_v58 }
 0x216   : > { %720 = vmatmul.mubr.f32.vlgmr.msra.gmra.mrb[2].mxu0 %v569_v60 }
 0x218   : > { %v577_v62 = vpop.permute.xlu1 %576 }
 0x219   : > { %v579_v63 = vmul.f32 %v577_v62, %v562_v61  ;;  %v807_v14 = vmul.f32 %v941_v10, %v577_v62 }
 0x21b   : > { %790 = vmatmul.mubr.f32.vlgmr.msra.gmra.mrb[2].mxu1 %v579_v63 }
 0x2e9   : > { %v979_v2 = vpop.f32.mrb[2].mxu0 }
 0x2ea   : > { %v980_v3 = vpop.f32.mrb[3].mxu0 }
 0x2eb   : > { %v981_v5 = vadd.f32 %v980_v3, %v979_v2 }
 0x2ed   : > { %v722_v6 = vadd.f32 %v981_v5, %v654_v4 }
 0x2ee   : > { %v1014_v7 = vpop.f32.mrb[2].mxu1 }
 0x2ef   : > { %v1015_v9 = vpop.f32.mrb[3].mxu1 }
 0x2f0   : > { %v1016_v40 = vadd.f32 %v1015_v9, %v1014_v7 }
 0x2f2   : > { %v792_v12 = vadd.f32 %v1016_v40, %v722_v6 }
 0x2f4   : > { %v801_v15 = vadd.f32 %v800_v11, %v792_v12 }
 0x2f6   : > { %v808_v17 = vadd.f32 %v807_v14, %v801_v15 }
 0x2f8   : > { %v815_v18 = vadd.f32 %v814_v16, %v808_v17 }
 0x2fa   : > { %816 = vst [vmem:[%s285_s19] sm:$0xff] %v815_v18 }
 0x2fb   : > { %1307 = shalt.err (!%p1304_p11)
}
 0x2fc   : > { %s1308_s10 = scalar_lea.hbm %s1584_s11, 128  ;;  %s1312_s16 = scalar_lea.hbm %s1632_s6, 256 }
 0x2fd   : > { %p1309_p13 = scmp.ne.s32.totalorder %s1584_s11, %s1308_s10  ;;  %p1313_p6 = scmp.lt.u32.totalorder %s1584_s11, %s1632_s6 }
 0x2fe   : > { %p1314_p9 = scmp.lt.u32.totalorder %s1312_s16, %s1308_s10  ;;  %p1316_p12 = scmp.lt.u32.totalorder %s1308_s10, %s1584_s11 }
 0x2ff   : > { %p1310_p0 = pnand %p1309_p13, %p1645_p1 }
 0x300   : > { %p1315_p10 = por %p1314_p9, %p1313_p6 }
 0x301   : > { %p1311_p5 = pneg %p1310_p0 }
 0x302   : > { %p1317_p2 = por %p1316_p12, %p1315_p10 }
 0x304   : > { %p1318_p3 = pnand %p1317_p2, %p1311_p5 }
 0x306   : > { %1321 = shalt.err (!%p1318_p3)
}
 0x307   : > { %1153 = dma.vmem_to_hbm [thread:$0]  (%p1645_p1), %s1586_s20, 128, %s1584_s11, %s818_s29  }
 0x308 PF: > { %p1170_p4 = scmp.ge.s32.totalorder %s1364_s24, 2  ;;  %s843_s19 = sand.u32 1, %s1352_s21  }
 0x309   : > { %p1646_p7 = scmp.ne.s32.totalorder %s1637_s8, 0  ;;  %s844_s26 = scalar_lea.sflag [#allocation4], %s843_s19 }
 0x30b   : > { %p1163_p8 = pnand %p1170_p4, %p1646_p7 }
 0x30d   : > { %1347 = dma.done.wait (!%p1163_p8), %s844_s26, 128  }
 0x30e   : > { %1349 = vsyncadd (!%p1163_p8), %s844_s26, 4294967168  ;;  %p18_p11 = scmp.ge.s32.totalorder %s1438_s27, 4   ;;  %s1647_s21 = smov %s1356_s22 }
 0x30f   : > { %s1648_s22 = smov %s1360_s23  ;;  %s1649_s23 = smov %s1449_s30 }
 0x310   : > { %s1650_s24 = smov %s1438_s27  ;;  %20 = sbr.rel (!%p18_p11) target bundleno = 5 (0x5), region = 91 }
 0x317   :  { %849 = vsyncpa [#allocation3], 1 }
 0x318   :  { %851 = vsyncpa [#allocation3 + $0x1], 1 }
 0x319   :  { %852 = vsyncpa [#allocation6], 1 }
 0x31a   :  { %853 = vsyncpa [#allocation4], 1 }
 0x31b   :  { %855 = vsyncpa [#allocation4 + $0x1], 1 }

</bundles_post_ra>
